<compile_context>
chip_gen: v6e
topology: v6e:2x2x1
jax: 0.10.0
libtpu: 0.0.40
codegen_flags: <defaults>
</compile_context>

<pallas_src>
import functools

import jax
import jax.numpy as jnp
import numpy as np
from jax import lax
from jax.experimental import pallas as pl
from jax.experimental.pallas import tpu as pltpu


def _fa_forward_kernel(seed_ref, x_ref, w1_ref, w2_ref, out_ref, *,
                       dropout_p: float, training: bool, bf16_matmul_inputs: bool):
    """One batch tile: out_row[1, TILE_B] = dropout(tanh(X W1)) @ w2_row^T."""
    x = x_ref[...]
    w1 = w1_ref[...]
    if bf16_matmul_inputs:
        # MXU-native inputs; accumulation stays f32 (useful when Din/H are large).
        x = x.astype(jnp.bfloat16)
        w1 = w1.astype(jnp.bfloat16)

    # First layer: MXU matmul (f32 accumulate) + EUP tanh.
    hidden = jnp.tanh(jnp.dot(x, w1, preferred_element_type=jnp.float32))

    if training and dropout_p > 0.0:
        tile_b, h = hidden.shape
        # Counter-based hash PRNG (lowbias32-style), keyed on (seed, global element id).
        # Pure jnp integer ops -> lowers on Mosaic and in interpret mode, and the mask is
        # independent of the chosen TILE_B (global row index, not tile-local).
        row0 = pl.program_id(0) * tile_b
        rows = lax.broadcasted_iota(jnp.int32, (tile_b, h), 0)
        cols = lax.broadcasted_iota(jnp.int32, (tile_b, h), 1)
        idx = (row0 + rows) * h + cols

        seed_mix = seed_ref[0].astype(jnp.uint32) * jnp.uint32(0x9E3779B9)
        bits = idx.astype(jnp.uint32) + seed_mix
        bits = bits ^ (bits >> 16)
        bits = bits * jnp.uint32(0x7FEB352D)
        bits = bits ^ (bits >> 15)
        bits = bits * jnp.uint32(0x846CA68B)
        bits = bits ^ (bits >> 16)

        # drop iff bits < p * 2^32  ->  keep prob = 1 - p   (p < 1 enforced in wrapper)
        threshold = jnp.uint32(int(dropout_p * (2.0 ** 32)))
        keep = bits >= threshold
        hidden = jnp.where(keep,
                           hidden * jnp.float32(1.0 / (1.0 - dropout_p)),
                           jnp.float32(0.0))

    # Second layer: lane-dense VPU multiply + lane (XLU) reduction.
    # w2_ref is the [1, H] weight row, already pre-scaled by 1/sqrt(H) at setup time.
    pred_col = jnp.sum(hidden * w2_ref[...], axis=-1, keepdims=True)   # (TILE_B, 1)
    out_ref[...] = pred_col.T.astype(out_ref.dtype)                    # (1, TILE_B)


def _auto_tile_b(batch: int, d_in: int, hidden: int,
                 vmem_budget_bytes: int = 16 * 1024 * 1024) -> int:
    """Largest batch tile that fits a conservative VMEM budget (v7x-safe)."""
    resident = 4 * (d_in * hidden + hidden)        # W1 + W2 row stay resident
    per_row = 4 * (2 * d_in + hidden + 2)          # 2x X (dbl-buf) + hidden tmp + 2x out
    t = max(8, (vmem_budget_bytes - resident) // per_row)
    t = int(min(t, 512, batch))
    if t < batch:
        t = (t // 128) * 128 if t >= 128 else (t // 8) * 8
        t = max(t, 8)
    return t


def two_layer_fa_dropout_tanh(x, w1_t, w2_row_scaled, *, dropout_p: float,
                              seed: int = 0, training: bool = True,
                              tile_b: int | None = None,
                              bf16_matmul_inputs: bool = False):
    """Forward pass.

    x:             [B, Din]  float32
    w1_t:          [Din, H]  float32   (= W1.T of the torch module)
    w2_row_scaled: [1, H]    float32   (= W2 row, pre-scaled by 1/sqrt(H) at setup time)
    returns        [B, 1]    float32
    """
    B, Din = x.shape
    H = w1_t.shape[1]
    assert w1_t.shape == (Din, H) and w2_row_scaled.shape == (1, H)
    assert 0.0 <= dropout_p < 1.0, "dropout_p must be in [0, 1)"

    if tile_b is None:
        tile_b = _auto_tile_b(B, Din, H)
    tile_b = min(tile_b, B)
    num_tiles = pl.cdiv(B, tile_b)

    kernel = functools.partial(
        _fa_forward_kernel,
        dropout_p=float(dropout_p),
        training=bool(training),
        bf16_matmul_inputs=bool(bf16_matmul_inputs),
    )

    seed_arr = jnp.asarray([seed], dtype=jnp.int32)

    out_slab = pl.pallas_call(
        kernel,
        # Lane-dense output slab: batch on the 128-lane axis; reshaped to (B, 1) below.
        out_shape=jax.ShapeDtypeStruct((1, B), jnp.float32),
        grid_spec=pltpu.PrefetchScalarGridSpec(
            num_scalar_prefetch=1,                 # seed lands in SMEM
            grid=(num_tiles,),                     # batch tiles -> software pipelining
            in_specs=[
                pl.BlockSpec((tile_b, Din), lambda i, seed: (i, 0)),  # X: tiled over batch
                pl.BlockSpec((Din, H), lambda i, seed: (0, 0)),       # W1: resident
                pl.BlockSpec((1, H), lambda i, seed: (0, 0)),         # W2 row: resident
            ],
            out_specs=pl.BlockSpec((1, tile_b), lambda i, seed: (0, i)),
        ),
        compiler_params=pltpu.CompilerParams(
            dimension_semantics=("parallel",),     # batch tiles shard across TCs on v7x
            vmem_limit_bytes=32 * 1024 * 1024,     # fits v5e/v6e/v7x scoped VMEM
        ),
    )(seed_arr, x, w1_t, w2_row_scaled)

    return out_slab.reshape(B, 1)


if __name__ == "__main__":
    # Small shapes consistent with the module; batch large enough to exercise tiling.
    batch = 512
    input_features = 32
    hidden_features = 32
    dropout_prob = 0.25

    key = jax.random.PRNGKey(0)
    kx, kw1, kw2 = jax.random.split(key, 3)

    x = jax.random.normal(kx, (batch, input_features), dtype=jnp.float32)

    # torch.nn.Linear-style uniform init bounds.
    bound1 = 1.0 / np.sqrt(input_features)
    bound2 = 1.0 / np.sqrt(hidden_features)
    # W1: torch [hidden, input] -> stored pre-transposed [input, hidden].
    w1_t = jax.random.uniform(kw1, (input_features, hidden_features),
                              minval=-bound1, maxval=bound1, dtype=jnp.float32)
    # W2: torch [1, hidden] -> stored as a lane-dense row [1, hidden].
    w2_row = jax.random.uniform(kw2, (1, hidden_features),
                                minval=-bound2, maxval=bound2, dtype=jnp.float32)
    # Fold the 1/sqrt(hidden_features) output scale into W2 once at parameter setup.
    w2_row_scaled = w2_row / np.float32(np.sqrt(hidden_features))

    # Training-mode run (dropout active).
    out_train = two_layer_fa_dropout_tanh(
        x, w1_t, w2_row_scaled, dropout_p=dropout_prob,
        seed=1234, training=True, tile_b=128,
    )
    out_train = jax.block_until_ready(out_train)
    assert out_train.shape == (batch, 1) and out_train.dtype == jnp.float32
    assert bool(jnp.all(jnp.isfinite(out_train)))

    # Eval-mode run (dropout = identity) checked against a pure-JAX reference.
    out_eval = jax.block_until_ready(
        two_layer_fa_dropout_tanh(x, w1_t, w2_row_scaled, dropout_p=dropout_prob,
                                  training=False, tile_b=128)
    )
    ref = (jnp.tanh(x @ w1_t) @ w2_row.T) / np.sqrt(hidden_features)
    np.testing.assert_allclose(np.asarray(out_eval), np.asarray(ref),
                               rtol=1e-5, atol=1e-5)

    print("KERNEL_OK")
</pallas_src>

<mosaic_0001>
module attributes {stable_mosaic.version = 11 : i64} {
  func.func @_fa_forward_kernel(%arg0: i32, %arg1: memref<1xi32, #tpu.memory_space<smem>>, %arg2: memref<128x32xf32, #tpu.memory_space<vmem>>, %arg3: memref<32x32xf32, #tpu.memory_space<vmem>>, %arg4: memref<1x32xf32, #tpu.memory_space<vmem>>, %arg5: memref<1x128xf32, #tpu.memory_space<vmem>>) attributes {dimension_semantics = [#tpu.dimension_semantics<parallel>], iteration_bounds = array<i64: 4>, scalar_prefetch = 1 : i64, scratch_operands = 0 : i64, tpu.core_type = #tpu.core_type<tc>, window_params = [{transform_indices = @transform_0, window_bounds = array<i64: 128, 32>}, {pipeline_mode = #tpu.pipeline_mode<synchronous>, transform_indices = @transform_1, window_bounds = array<i64: 32, 32>}, {pipeline_mode = #tpu.pipeline_mode<synchronous>, transform_indices = @transform_2, window_bounds = array<i64: 1, 32>}, {transform_indices = @transform_3, window_bounds = array<i64: 1, 128>}]} {
    %c0 = arith.constant 0 : index
    %c0_0 = arith.constant 0 : index
    %0 = vector.load %arg2[%c0, %c0_0] : memref<128x32xf32, #tpu.memory_space<vmem>>, vector<128x32xf32>
    %c0_1 = arith.constant 0 : index
    %c0_2 = arith.constant 0 : index
    %1 = vector.load %arg3[%c0_1, %c0_2] : memref<32x32xf32, #tpu.memory_space<vmem>>, vector<32x32xf32>
    %cst = arith.constant dense<0.000000e+00> : vector<128x32xf32>
    %2 = tpu.matmul %0, %1, %cst {dimension_numbers = #tpu.dot_dimension_numbers<[1], [0], [0], [1], [0, 0, 1, 1], [], []>} : vector<128x32xf32>, vector<32x32xf32>, vector<128x32xf32> -> vector<128x32xf32>
    %3 = math.tanh %2 : vector<128x32xf32>
    %c128_i32 = arith.constant 128 : i32
    %4 = arith.muli %arg0, %c128_i32 : i32
    %5 = tpu.iota {dimensions = array<i32: 0>} : vector<128x32xi32>
    %6 = tpu.iota {dimensions = array<i32: 1>} : vector<128x32xi32>
    %7 = vector.broadcast %4 : i32 to vector<128x32xi32>
    %8 = arith.addi %7, %5 : vector<128x32xi32>
    %c32_i32 = arith.constant 32 : i32
    %9 = vector.broadcast %c32_i32 : i32 to vector<128x32xi32>
    %10 = arith.muli %8, %9 : vector<128x32xi32>
    %11 = arith.addi %10, %6 : vector<128x32xi32>
    %c0_3 = arith.constant 0 : index
    %12 = memref.load %arg1[%c0_3] : memref<1xi32, #tpu.memory_space<smem>>
    %c-1640531527_i32 = arith.constant -1640531527 : i32
    %13 = arith.muli %12, %c-1640531527_i32 : i32
    %14 = vector.broadcast %13 : i32 to vector<128x32xi32>
    %15 = arith.addi %11, %14 : vector<128x32xi32>
    %c16_i32 = arith.constant 16 : i32
    %16 = vector.broadcast %c16_i32 : i32 to vector<128x32xi32>
    %17 = arith.shrui %15, %16 : vector<128x32xi32>
    %18 = arith.xori %15, %17 : vector<128x32xi32>
    %c2146121005_i32 = arith.constant 2146121005 : i32
    %19 = vector.broadcast %c2146121005_i32 : i32 to vector<128x32xi32>
    %20 = arith.muli %18, %19 : vector<128x32xi32>
    %c15_i32 = arith.constant 15 : i32
    %21 = vector.broadcast %c15_i32 : i32 to vector<128x32xi32>
    %22 = arith.shrui %20, %21 : vector<128x32xi32>
    %23 = arith.xori %20, %22 : vector<128x32xi32>
    %c-2073254261_i32 = arith.constant -2073254261 : i32
    %24 = vector.broadcast %c-2073254261_i32 : i32 to vector<128x32xi32>
    %25 = arith.muli %23, %24 : vector<128x32xi32>
    %c16_i32_4 = arith.constant 16 : i32
    %26 = vector.broadcast %c16_i32_4 : i32 to vector<128x32xi32>
    %27 = arith.shrui %25, %26 : vector<128x32xi32>
    %28 = arith.xori %25, %27 : vector<128x32xi32>
    %c1073741824_i32 = arith.constant 1073741824 : i32
    %29 = vector.broadcast %c1073741824_i32 : i32 to vector<128x32xi32>
    %30 = arith.cmpi uge, %28, %29 : vector<128x32xi32>
    %cst_5 = arith.constant 1.33333337 : f32
    %31 = vector.broadcast %cst_5 : f32 to vector<128x32xf32>
    %32 = arith.mulf %3, %31 : vector<128x32xf32>
    %cst_6 = arith.constant 0.000000e+00 : f32
    %33 = vector.broadcast %cst_6 : f32 to vector<128x32xf32>
    %34 = arith.select %30, %32, %33 : vector<128x32xi1>, vector<128x32xf32>
    %c0_7 = arith.constant 0 : index
    %c0_8 = arith.constant 0 : index
    %35 = vector.load %arg4[%c0_7, %c0_8] : memref<1x32xf32, #tpu.memory_space<vmem>>, vector<1x32xf32>
    %36 = vector.broadcast %35 : vector<1x32xf32> to vector<128x32xf32>
    %37 = arith.mulf %34, %36 : vector<128x32xf32>
    %cst_9 = arith.constant dense<0.000000e+00> : vector<128xf32>
    %38 = vector.multi_reduction <add>, %37, %cst_9 [1] : vector<128x32xf32> to vector<128xf32>
    %39 = vector.shape_cast %38 : vector<128xf32> to vector<128x1xf32>
    %40 = tpu.transpose %39, [1, 0] : vector<128x1xf32> -> vector<1x128xf32>
    %c0_10 = arith.constant 0 : index
    %c0_11 = arith.constant 0 : index
    %41 = vector.load %arg5[%c0_10, %c0_11] : memref<1x128xf32, #tpu.memory_space<vmem>>, vector<1x128xf32>
    tpu.vector_store %arg5[%c0_10, %c0_11], %40 {strides = array<i32>} : memref<1x128xf32, #tpu.memory_space<vmem>>, vector<1x128xf32>,
    return
  }
  func.func @transform_0(%arg0: i32, %arg1: memref<1xi32, #tpu.memory_space<smem>>) -> (i32, i32) {
    %c0_i32 = arith.constant 0 : i32
    %c0_i32_0 = arith.constant 0 : i32
    return %arg0, %c0_i32 : i32, i32
  }
  func.func @transform_1(%arg0: i32, %arg1: memref<1xi32, #tpu.memory_space<smem>>) -> (i32, i32) {
    %c0_i32 = arith.constant 0 : i32
    %c0_i32_0 = arith.constant 0 : i32
    %c0_i32_1 = arith.constant 0 : i32
    return %c0_i32, %c0_i32_0 : i32, i32
  }
  func.func @transform_2(%arg0: i32, %arg1: memref<1xi32, #tpu.memory_space<smem>>) -> (i32, i32) {
    %c0_i32 = arith.constant 0 : i32
    %c0_i32_0 = arith.constant 0 : i32
    %c0_i32_1 = arith.constant 0 : i32
    return %c0_i32, %c0_i32_0 : i32, i32
  }
  func.func @transform_3(%arg0: i32, %arg1: memref<1xi32, #tpu.memory_space<smem>>) -> (i32, i32) {
    %c0_i32 = arith.constant 0 : i32
    %c0_i32_0 = arith.constant 0 : i32
    return %c0_i32, %arg0 : i32, i32
  }
}

</mosaic_0001>

<bundles_post_ra>
// kernel: tpu_custom_call.1
= control target key start
LH: loop header
LB: loop body
LE: loop exit
PB: predicated region body
PF: predicated region fallthrough
CT: control target
= control target key end

     0   :  { %s1440_s0 = inlined_call_operand.<no memory space> [shape: s32[1], index: 0, kind: input, shape index: {}]   ;;  %s1441_s1 = inlined_call_operand.vmem [shape: f32[512,32], index: 1, kind: input, shape index: {}]   ;;  %s1442_s2 = inlined_call_operand.vmem [shape: f32[32,32], index: 2, kind: input, shape index: {}]   ;;  %s1443_s3 = inlined_call_operand.vmem [shape: f32[1,32], index: 3, kind: input, shape index: {}]   ;;  %s1444_s4 = inlined_call_operand.hbm [shape: f32[1,512], index: 4, kind: output, shape index: {}]  }
   0x1   :  { %9 = sst [smem:[#allocation3]] %s1440_s0 }
   0x2   :  { %10 = vsyncpa [#allocation5], 0 }
   0x3   :  { %12 = vsyncpa [#allocation5 + $0x1], 0  ;;  %s1087_s17 = smov 0   ;;  %s1089_s18 = smov 0  }
   0x4   :  { %s1091_s19 = smov 0   ;;  %s1093_s20 = smov 0  }
   0x5 LB: > { %s1108_s0 = sadd.s32 4294967295, %s1056_s20   ;;  %s838_s21 = sadd.s32 4294967294, %s1056_s20   ;;  %s1056_s20 = sphi %s1093_s20, %s1450_s20   ;;  %s1052_s19 = sphi %s1091_s19, %s1449_s19   ;;  %s1048_s18 = sphi %s1089_s18, %s1448_s18   ;;  %s1044_s17 = sphi %s1087_s17, %s1447_s17  }
   0x6   : > { %s1112_s22 = sadd.s32 1, %s1056_s20   ;;  %s93_s23 = sadd.s32 1, %s1052_s19 }
   0x7   : > { %s90_s24 = ssub.s32 %s1056_s20, %s1112_s22  ;;  %p103_p0 = scmp.ne.s32.totalorder %s1052_s19, %s1048_s18 }
   0x8   : > { %p91_p1 = scmp.eq.s32.totalorder %s90_s24, 0  ;;  %p104_p2 = scmp.eq.s32.totalorder %s1108_s0, 3 }
   0x9   : > { %p109_p3 = scmp.ne.s32.totalorder %s1048_s18, %s1044_s17  ;;  %p110_p4 = scmp.eq.s32.totalorder %s838_s21, 3 }
   0xa   : > { %s1123_s25 = scalar_select %p91_p1, %s1052_s19, %s93_s23  }
   0xb   : > { %p1125_p5 = por %p104_p2, %p103_p0  ;;  %p1129_p6 = por %p110_p4, %p109_p3 }
   0xc   : > { %p841_p7 = scmp.ge.s32.totalorder %s1056_s20, 1  ;;  %p143_p8 = scmp.lt.s32.totalorder %s1056_s20, 5 }
   0xe   : > { %p144_p9 = pnand %p841_p7, %p143_p8 }
   0xf   : > { %s1142_s6 = sshll.u32 (!%p144_p9), %s1108_s0, 4  ;;  %s860_s16 = sshll.u32 (!%p144_p9), %s1108_s0, 7 }
  0x10   : > { %147 = sbr.rel (%p144_p9) target bundleno = 523 (0x20b), region = 32  ;;  %p167_p10 = scmp.lt.s32.totalorder (!%p144_p9), %s1142_s6, 63 }
  0x11   : > { %s471_s21 = sld [smem:[#allocation3]] (!%p144_p9)  ;;  %s164_s28 = sand.u32 (!%p144_p9), 1, %s1048_s18  }
  0x12   : > { %s165_s29 = scalar_lea.vmem (!%p144_p9), [#allocation4], %s164_s28  ;;  %s781_s8 = scalar_lea.hbm (!%p144_p9), %s1444_s4, %s1142_s6 }
  0x13   : > { %s783_s30 = sshll.u32 (!%p144_p9), %s165_s29, 4  ;;  %s1058_s11 = smov (!%p144_p9), [#allocation4]   ;;  %s1401_s30 = int_to_ptr.vmem [resolvable:$true] %s783_s30 }
  0x14   : > { %s996_s10 = scalar_lea.vmem (!%p144_p9), %s1401_s30, 16 }
  0x15   : > { %v191_v0 = vld [vmem:[%s1442_s2 + $0x18] sm:$0xff]  ;;  %v190_v1 = vld [vmem:[%s1442_s2 + $0x10] sm:$0xff]  ;;  %v189_v2 = vld [vmem:[%s1442_s2 + $0x8] sm:$0xff]  ;;  %s168_s9 = scalar_select %p167_p10, %s1142_s6, 63  ;;  %vm192_vm0 = vcmask 261120   ;;  %v403_v20 = vlaneseq  ;;  %v1193_v23 = vstv %s860_s16 }
  0x16   : > { %885 = vmatprep.subr.mxu0 %v191_v0  ;;  %917 = vmatprep.subr.mxu1 %v191_v0  ;;  %v188_v3 = vld [vmem:[%s1442_s2] sm:$0xff]  ;;  %p997_p11 = scmp.ne.s32.totalorder %s1401_s30, %s996_s10 }
  0x17   : > { %886 = vmatpush3.msra.mxu0 %v191_v0  ;;  %921 = vmatpush3.msra.mxu1 %v191_v0  ;;  %s843_s12 = sshll.u32 %s168_s9, 3  ;;  %v1189_v21 = vshrl.u32 %v403_v20, 7  ;;  %v1199_v27 = vand.u32 127, %v403_v20  ;;  %s472_s23 = smul.u32 2654435769, %s471_s21 }
  0x18   : > { %887 = vmatprep.subr.mxu0 %v190_v1  ;;  %918 = vmatprep.subr.mxu1 %v190_v1  ;;  %s1155_s15 = scalar_lea.vmem %s1441_s1, %s843_s12  ;;  %s771_s9 = scalar_lea.sflag [#allocation5], %s164_s28 }
  0x19   : > { %888 = vmatpush3.msra.mxu0 %v190_v1  ;;  %922 = vmatpush3.msra.mxu1 %v190_v1  ;;  %v172_v4 = vld [vmem:[%s1155_s15] sm:$0xff]  ;;  %v173_v5 = vld [vmem:[%s1155_s15 + $0x8] sm:$0xff]  ;;  %v174_v6 = vld [vmem:[%s1155_s15 + $0x10] sm:$0xff]  ;;  %v405_v22 = vadd.s32 8, %v1189_v21  ;;  %v423_v25 = vadd.s32 %v1193_v23, %v1189_v21  ;;  %v406_v26 = vadd.s32 16, %v1189_v21  ;;  %v1203_v32 = vstv %s472_s23  ;;  %p998_p12 = pnand %p997_p11, %p1125_p5  ;;  %s1000_s12 = sshll.u32 %s1058_s11, 4  ;;  %s1001_s12 = int_to_ptr.vmem [resolvable:$false] %s1000_s12 }
  0x1a   : > { %889 = vmatprep.subr.mxu0 %v189_v2  ;;  %919 = vmatprep.subr.mxu1 %v189_v2  ;;  %v180_v7 = vld [vmem:[%s1155_s15 + $0x40] sm:$0xff]  ;;  %v181_v8 = vld [vmem:[%s1155_s15 + $0x48] sm:$0xff]  ;;  %v182_v9 = vld [vmem:[%s1155_s15 + $0x50] sm:$0xff]  ;;  %v412_v33 = vadd.s32 64, %v1189_v21  ;;  %v407_v35 = vadd.s32 24, %v1189_v21  ;;  %v409_v37 = vadd.s32 40, %v1189_v21  ;;  %p1003_p0 = scmp.lt.s32.totalorder %s1401_s30, %s1001_s12 }
  0x1b   : > { %890 = vmatpush3.msra.mxu0 %v189_v2  ;;  %923 = vmatpush3.msra.mxu1 %v189_v2  ;;  %v175_v10 = vld [vmem:[%s1155_s15 + $0x18] sm:$0xff]  ;;  %v176_v11 = vld [vmem:[%s1155_s15 + $0x20] sm:$0xff]  ;;  %v177_v14 = vld [vmem:[%s1155_s15 + $0x28] sm:$0xff]  ;;  %v424_v24 = vadd.s32 %v1193_v23, %v405_v22  ;;  %v439_v29 = vmul.u32 32, %v423_v25  ;;  %v425_v30 = vadd.s32 %v1193_v23, %v406_v26  ;;  %v408_v39 = vadd.s32 32, %v1189_v21  ;;  %p999_p13 = pneg %p998_p12  ;;  %s1002_s13 = scalar_lea.vmem %s1001_s12, 32 }
  0x1c   : > { %891 = vmatprep.subr.mxu0 %v188_v3  ;;  %920 = vmatprep.subr.mxu1 %v188_v3  ;;  %v183_v12 = vld [vmem:[%s1155_s15 + $0x58] sm:$0xff]  ;;  %v184_v13 = vld [vmem:[%s1155_s15 + $0x60] sm:$0xff]  ;;  %v178_v15 = vld [vmem:[%s1155_s15 + $0x30] sm:$0xff]  ;;  %v414_v40 = vadd.s32 80, %v1189_v21  ;;  %v431_v41 = vadd.s32 %v1193_v23, %v412_v33  ;;  %v426_v43 = vadd.s32 %v1193_v23, %v407_v35  ;;  %v428_v45 = vadd.s32 %v1193_v23, %v409_v37  ;;  %p1004_p1 = scmp.lt.s32.totalorder %s1002_s13, %s996_s10 }
  0x1d   : > { %892 = vmatpush3.msra.mxu0 %v188_v3  ;;  %893 = vmatprep.mubr.msk.f32.mxu0 %vm192_vm0, %v172_v4  ;;  %v185_v16 = vld [vmem:[%s1155_s15 + $0x68] sm:$0xff]  ;;  %v186_v17 = vld [vmem:[%s1155_s15 + $0x70] sm:$0xff]  ;;  %v179_v18 = vld [vmem:[%s1155_s15 + $0x38] sm:$0xff]  ;;  %v440_v28 = vmul.u32 32, %v424_v24  ;;  %v455_v34 = vadd.s32 %v439_v29, %v1199_v27  ;;  %v441_v36 = vmul.u32 32, %v425_v30  ;;  %v427_v47 = vadd.s32 %v1193_v23, %v408_v39 }
  0x1e   : > { %894 = vmatmul.mubr.msk.f32.vlgmr.msra.gmra.mxu0 %vm192_vm0, %v173_v5  ;;  %924 = vmatpush3.msra.mxu1 %v188_v3  ;;  %v187_v19 = vld [vmem:[%s1155_s15 + $0x78] sm:$0xff]  ;;  %v433_v48 = vadd.s32 %v1193_v23, %v414_v40  ;;  %v411_v49 = vadd.s32 56, %v1189_v21  ;;  %v447_v50 = vmul.u32 32, %v431_v41  ;;  %v416_v51 = vadd.s32 96, %v1189_v21  ;;  %p1005_p2 = por %p1004_p1, %p1003_p0 }
  0x1f   : > { %896 = vmatprep.mubr.msk.f32.mxu0 %vm192_vm0, %v174_v6  ;;  %905 = vmatprep.mubr.msk.f32.mxu1 %vm192_vm0, %v180_v7  ;;  %v456_v31 = vadd.s32 %v440_v28, %v1199_v27  ;;  %v474_v42 = vadd.s32 %v1203_v32, %v455_v34  ;;  %v457_v44 = vadd.s32 %v441_v36, %v1199_v27  ;;  %v442_v53 = vmul.u32 32, %v426_v43 }
  0x20   : > { %906 = vmatmul.mubr.msk.f32.vlgmr.msra.gmra.mxu1 %vm192_vm0, %v181_v8  ;;  %v413_v54 = vadd.s32 72, %v1189_v21  ;;  %v444_v56 = vmul.u32 32, %v428_v45  ;;  %v443_v58 = vmul.u32 32, %v427_v47  ;;  %v430_v60 = vadd.s32 %v1193_v23, %v411_v49  ;;  %p1006_p3 = pnand %p1005_p2, %p999_p13 }
  0x21   : > { %908 = vmatprep.mubr.msk.f32.mxu1 %vm192_vm0, %v182_v9  ;;  %v475_v38 = vadd.s32 %v1203_v32, %v456_v31  ;;  %v490_v52 = vshrl.u32 %v474_v42, 16  ;;  %v476_v55 = vadd.s32 %v1203_v32, %v457_v44  ;;  %v449_v59 = vmul.u32 32, %v433_v48 }
  0x22   : > { %897 = vmatmul.mubr.msk.f32.gmra.mxu0 %vm192_vm0, %v175_v10  ;;  %v463_v61 = vadd.s32 %v447_v50, %v1199_v27  ;;  %v435_v62 = vadd.s32 %v1193_v23, %v416_v51  ;;  %v458_v0 = vadd.s32 %v442_v53, %v1199_v27  ;;  %v432_v1 = vadd.s32 %v1193_v23, %v413_v54 }
  0x23   : > { %899 = vmatprep.mubr.msk.f32.mxu0 %vm192_vm0, %v176_v11  ;;  %v491_v46 = vshrl.u32 %v475_v38, 16  ;;  %v506_v63 = vxor.u32 %v490_v52, %v474_v42  ;;  %v492_v2 = vshrl.u32 %v476_v55, 16  ;;  %v460_v3 = vadd.s32 %v444_v56, %v1199_v27 }
  0x24   : > { %909 = vmatmul.mubr.msk.f32.gmra.mxu1 %vm192_vm0, %v183_v12  ;;  %v459_v5 = vadd.s32 %v443_v58, %v1199_v27  ;;  %v465_v6 = vadd.s32 %v449_v59, %v1199_v27  ;;  %v446_v7 = vmul.u32 32, %v430_v60  ;;  %v482_v8 = vadd.s32 %v1203_v32, %v463_v61 }
  0x25   : > { %911 = vmatprep.mubr.msk.f32.mxu1 %vm192_vm0, %v184_v13  ;;  %v507_v57 = vxor.u32 %v491_v46, %v475_v38  ;;  %v451_v9 = vmul.u32 32, %v435_v62  ;;  %v415_v10 = vadd.s32 88, %v1189_v21  ;;  %v410_v11 = vadd.s32 48, %v1189_v21 }
  0x26   : > { %900 = vmatmul.mubr.msk.f32.gmra.mxu0 %vm192_vm0, %v177_v14  ;;  %v522_v12 = vmul.u32 2146121005, %v506_v63  ;;  %v477_v13 = vadd.s32 %v1203_v32, %v458_v0  ;;  %v448_v14 = vmul.u32 32, %v432_v1  ;;  %v462_v20 = vadd.s32 %v446_v7, %v1199_v27 }
  0x27   : > { %902 = vmatprep.mubr.msk.f32.mxu0 %vm192_vm0, %v178_v15  ;;  %v523_v4 = vmul.u32 2146121005, %v507_v57  ;;  %v508_v15 = vxor.u32 %v492_v2, %v476_v55  ;;  %v498_v22 = vshrl.u32 %v482_v8, 16  ;;  %v467_v24 = vadd.s32 %v451_v9, %v1199_v27 }
  0x28   : > { %912 = vmatmul.mubr.msk.f32.gmra.mxu1 %vm192_vm0, %v185_v16  ;;  %v479_v16 = vadd.s32 %v1203_v32, %v460_v3  ;;  %v434_v25 = vadd.s32 %v1193_v23, %v415_v10  ;;  %v429_v26 = vadd.s32 %v1193_v23, %v410_v11  ;;  %v538_v28 = vshrl.u32 %v522_v12, 15 }
  0x29   : > { %914 = vmatprep.mubr.msk.f32.mxu1 %vm192_vm0, %v186_v17  ;;  %v539_v17 = vshrl.u32 %v523_v4, 15  ;;  %v493_v29 = vshrl.u32 %v477_v13, 16  ;;  %v464_v30 = vadd.s32 %v448_v14, %v1199_v27  ;;  %v524_v31 = vmul.u32 2146121005, %v508_v15 }
  0x2a   : > { %903 = vmatmul.mubr.msk.f32.gmra.mxu0 %vm192_vm0, %v179_v18  ;;  %v478_v18 = vadd.s32 %v1203_v32, %v459_v5  ;;  %v495_v33 = vshrl.u32 %v479_v16, 16  ;;  %v418_v34 = vadd.s32 112, %v1189_v21  ;;  %v481_v38 = vadd.s32 %v1203_v32, %v462_v20 }
  0x2b   : > { %v555_v35 = vxor.u32 %v539_v17, %v523_v4  ;;  %v514_v39 = vxor.u32 %v498_v22, %v482_v8  ;;  %v486_v40 = vadd.s32 %v1203_v32, %v467_v24  ;;  %v450_v41 = vmul.u32 32, %v434_v25 }
  0x2c   : > { %915 = vmatmul.mubr.msk.f32.gmra.mxu1 %vm192_vm0, %v187_v19  ;;  %v484_v19 = vadd.s32 %v1203_v32, %v465_v6  ;;  %v494_v36 = vshrl.u32 %v478_v18, 16  ;;  %v445_v42 = vmul.u32 32, %v429_v26  ;;  %v554_v43 = vxor.u32 %v538_v28, %v522_v12 }
  0x2d   : > { %v509_v44 = vxor.u32 %v493_v29, %v477_v13  ;;  %v483_v45 = vadd.s32 %v1203_v32, %v464_v30  ;;  %v540_v46 = vshrl.u32 %v524_v31, 15  ;;  %v511_v47 = vxor.u32 %v495_v33, %v479_v16 }
  0x2e   : > { %v500_v37 = vshrl.u32 %v484_v19, 16  ;;  %v417_v48 = vadd.s32 104, %v1189_v21  ;;  %v437_v49 = vadd.s32 %v1193_v23, %v418_v34  ;;  %v571_v50 = vmul.u32 2221713035, %v555_v35 }
  0x2f   : > { %v510_v51 = vxor.u32 %v494_v36, %v478_v18  ;;  %v497_v53 = vshrl.u32 %v481_v38, 16  ;;  %v530_v54 = vmul.u32 2146121005, %v514_v39  ;;  %v502_v55 = vshrl.u32 %v486_v40, 16 }
  0x30   : > { %v516_v52 = vxor.u32 %v500_v37, %v484_v19  ;;  %v466_v56 = vadd.s32 %v450_v41, %v1199_v27  ;;  %v461_v57 = vadd.s32 %v445_v42, %v1199_v27  ;;  %v570_v58 = vmul.u32 2221713035, %v554_v43 }
  0x31   : > { %v525_v59 = vmul.u32 2146121005, %v509_v44  ;;  %v499_v60 = vshrl.u32 %v483_v45, 16  ;;  %v419_v61 = vadd.s32 120, %v1189_v21  ;;  %v556_v62 = vxor.u32 %v540_v46, %v524_v31 }
  0x32   : > { %v527_v63 = vmul.u32 2146121005, %v511_v47  ;;  %v436_v0 = vadd.s32 %v1193_v23, %v417_v48  ;;  %v453_v1 = vmul.u32 32, %v437_v49  ;;  %v513_v4 = vxor.u32 %v497_v53, %v481_v38 }
  0x33   : > { %v526_v2 = vmul.u32 2146121005, %v510_v51  ;;  %v532_v3 = vmul.u32 2146121005, %v516_v52  ;;  %v546_v5 = vshrl.u32 %v530_v54, 15  ;;  %v518_v6 = vxor.u32 %v502_v55, %v486_v40 }
  0x34   : > { %v485_v7 = vadd.s32 %v1203_v32, %v466_v56  ;;  %v480_v8 = vadd.s32 %v1203_v32, %v461_v57  ;;  %v587_v9 = vshrl.u32 %v571_v50, 16  ;;  %v541_v10 = vshrl.u32 %v525_v59, 15 }
  0x35   : > { %v515_v11 = vxor.u32 %v499_v60, %v483_v45  ;;  %v438_v12 = vadd.s32 %v1193_v23, %v419_v61  ;;  %v572_v21 = vmul.u32 2221713035, %v556_v62  ;;  %v543_v13 = vshrl.u32 %v527_v63, 15 }
  0x36   : > { %v452_v14 = vmul.u32 32, %v436_v0  ;;  %v469_v15 = vadd.s32 %v453_v1, %v1199_v27  ;;  %v586_v16 = vshrl.u32 %v570_v58, 16  ;;  %v542_v17 = vshrl.u32 %v526_v2, 15 }
  0x37   : > { %v548_v18 = vshrl.u32 %v532_v3, 15  ;;  %v529_v19 = vmul.u32 2146121005, %v513_v4  ;;  %v562_v20 = vxor.u32 %v546_v5, %v530_v54  ;;  %v534_v22 = vmul.u32 2146121005, %v518_v6 }
  0x38   : > { %v501_v24 = vshrl.u32 %v485_v7, 16  ;;  %v496_v25 = vshrl.u32 %v480_v8, 16  ;;  %v1257_v26 = vxor.u32 %v587_v9, %v571_v50  ;;  %v557_v28 = vxor.u32 %v541_v10, %v525_v59 }
  0x39   : > { %v531_v29 = vmul.u32 2146121005, %v515_v11  ;;  %v454_v30 = vmul.u32 32, %v438_v12  ;;  %v588_v31 = vshrl.u32 %v572_v21, 16  ;;  %v559_v23 = vxor.u32 %v543_v13, %v527_v63 }
  0x3a   : > { %v468_v33 = vadd.s32 %v452_v14, %v1199_v27  ;;  %v488_v34 = vadd.s32 %v1203_v32, %v469_v15  ;;  %v1261_v35 = vxor.u32 %v586_v16, %v570_v58  ;;  %v558_v36 = vxor.u32 %v542_v17, %v526_v2 }
  0x3b   : > { %v564_v37 = vxor.u32 %v548_v18, %v532_v3  ;;  %v545_v38 = vshrl.u32 %v529_v19, 15  ;;  %v578_v40 = vmul.u32 2221713035, %v562_v20  ;;  %v550_v41 = vshrl.u32 %v534_v22, 15 }
  0x3c   : > { %v1263_v42 = vxor.u32 %v501_v24, %v485_v7  ;;  %v1265_v43 = vxor.u32 %v496_v25, %v480_v8  ;;  %v573_v44 = vmul.u32 2221713035, %v557_v28  ;;  %v547_v45 = vshrl.u32 %v531_v29, 15 }
  0x3d   : > { %v470_v46 = vadd.s32 %v454_v30, %v1199_v27  ;;  %v1268_v49 = vxor.u32 %v588_v31, %v572_v21  ;;  %v575_v50 = vmul.u32 2221713035, %v559_v23  ;;  %v487_v51 = vadd.s32 %v1203_v32, %v468_v33 }
  0x3e   : > { %v504_v52 = vshrl.u32 %v488_v34, 16  ;;  %v574_v53 = vmul.u32 2221713035, %v558_v36  ;;  %v580_v54 = vmul.u32 2221713035, %v564_v37  ;;  %v1271_v55 = vxor.u32 %v545_v38, %v529_v19 }
  0x3f   : > { %v594_v58 = vshrl.u32 %v578_v40, 16  ;;  %v1273_v59 = vxor.u32 %v550_v41, %v534_v22  ;;  %v533_v27 = vmul.u32 2146121005, %v1263_v42  ;;  %v528_v60 = vmul.u32 2146121005, %v1265_v43 }
  0x40   : > { %v589_v61 = vshrl.u32 %v573_v44, 16  ;;  %v1277_v62 = vxor.u32 %v547_v45, %v531_v29  ;;  %v489_v63 = vadd.s32 %v1203_v32, %v470_v46  ;;  %vm619_vm1 = vcmp.ge.u32.totalorder %v1257_v26, 1073741824  ;;  %v1317_v41 = vld [vmem:[%s1443_s3] ss:$0 sm:$0xff] }
  0x41   : > { %v591_v2 = vshrl.u32 %v575_v50, 16  ;;  %v503_v3 = vshrl.u32 %v487_v51, 16  ;;  %v1283_v4 = vxor.u32 %v504_v52, %v488_v34  ;;  %v590_v5 = vshrl.u32 %v574_v53, 16 }
  0x42   : > { %v596_v6 = vshrl.u32 %v580_v54, 16  ;;  %v577_v7 = vmul.u32 2221713035, %v1271_v55  ;;  %vm618_vm2 = vcmp.ge.u32.totalorder %v1261_v35, 1073741824  ;;  %v1287_v32 = vxor.u32 %v594_v58, %v578_v40 }
  0x43   : > { %v582_v10 = vmul.u32 2221713035, %v1273_v59  ;;  %v549_v11 = vshrl.u32 %v533_v27, 15  ;;  %v544_v12 = vshrl.u32 %v528_v60, 15  ;;  %v1290_v21 = vxor.u32 %v589_v61, %v573_v44 }
  0x44   : > { %v579_v13 = vmul.u32 2221713035, %v1277_v62  ;;  %v505_v14 = vshrl.u32 %v489_v63, 16  ;;  %v1295_v17 = vxor.u32 %v591_v2, %v575_v50  ;;  %v1297_v18 = vxor.u32 %v503_v3, %v487_v51 }
  0x45   : > { %v536_v19 = vmul.u32 2146121005, %v1283_v4  ;;  %v1300_v20 = vxor.u32 %v590_v5, %v574_v53  ;;  %v1302_v22 = vxor.u32 %v596_v6, %v580_v54  ;;  %v593_v24 = vshrl.u32 %v577_v7, 16 }
  0x46   : > { %vm620_vm3 = vcmp.ge.u32.totalorder %v1268_v49, 1073741824  ;;  %v598_v29 = vshrl.u32 %v582_v10, 16  ;;  %v1305_v30 = vxor.u32 %v549_v11, %v533_v27  ;;  %v1307_v31 = vxor.u32 %v544_v12, %v528_v60 }
  0x47   : > { %vm626_vm4 = vcmp.ge.u32.totalorder %v1287_v32, 1073741824  ;;  %v595_v23 = vshrl.u32 %v579_v13, 16  ;;  %v1310_v33 = vxor.u32 %v505_v14, %v489_v63  ;;  %vm621_vm5 = vcmp.ge.u32.totalorder %v1290_v21, 1073741824 }
  0x48   : > { %v535_v37 = vmul.u32 2146121005, %v1297_v18  ;;  %vm623_vm6 = vcmp.ge.u32.totalorder %v1295_v17, 1073741824  ;;  %v1320_v42 = vxor.u32 %v593_v24, %v577_v7  ;;  %vm622_vm7 = vcmp.ge.u32.totalorder %v1300_v20, 1073741824 }
  0x49   : > { %vm628_vm8 = vcmp.ge.u32.totalorder %v1302_v22, 1073741824  ;;  %v1324_v44 = vxor.u32 %v598_v29, %v582_v10  ;;  %v581_v45 = vmul.u32 2221713035, %v1305_v30  ;;  %v576_v46 = vmul.u32 2221713035, %v1307_v31 }
  0x4a   : > { %v1330_v51 = vxor.u32 %v595_v23, %v579_v13  ;;  %v537_v52 = vmul.u32 2146121005, %v1310_v33  ;;  %v551_v55 = vshrl.u32 %v535_v37, 15  ;;  %vm625_vm9 = vcmp.ge.u32.totalorder %v1320_v42, 1073741824 }
  0x4b   : > { %vm630_vm10 = vcmp.ge.u32.totalorder %v1324_v44, 1073741824  ;;  %v597_v35 = vshrl.u32 %v581_v45, 16  ;;  %v592_v3 = vshrl.u32 %v576_v46, 16 }
  0x4c   : > { %v1349_v4 = vxor.u32 %v551_v55, %v535_v37  ;;  %vm627_vm11 = vcmp.ge.u32.totalorder %v1330_v51, 1073741824 }
  0x4d   : > { %v608_v24 = vxor.u32 %v592_v3, %v576_v46  ;;  %v613_v22 = vxor.u32 %v597_v35, %v581_v45 }
  0x4f   : > { %vm624_vm12 = vcmp.ge.u32.totalorder %v608_v24, 1073741824  ;;  %vm629_vm13 = vcmp.ge.u32.totalorder %v613_v22, 1073741824 }
  0xde   : > { %v895_v39 = vpop.f32.mrf.mxu0 }
  0xdf   : > { %964 = vtanh.f32 %v895_v39  ;;  %v552_v39 = vshrl.u32 %v536_v19, 15 }
  0xe0   : > { %v307_v47 = vpop.f32.mrf.mxu0  ;;  %v907_v48 = vpop.f32.mrf.mxu1 }
  0xe1   : > { %966 = vtanh.f32 %v307_v47 }
  0xe2   : > { %v898_v56 = vpop.f32.mrf.mxu0  ;;  %v347_v57 = vpop.f32.mrf.mxu1 }
  0xe3   : > { %968 = vtanh.f32 %v898_v56  ;;  %v1335_v56 = vxor.u32 %v552_v39, %v536_v19 }
  0xe4   : > { %v317_v0 = vpop.f32.mrf.mxu0  ;;  %970 = vtanh.f32 %v347_v57  ;;  %v1280_v1 = vpop.f32.mrf.mxu1 }
  0xe5   : > { %972 = vtanh.f32 %v317_v0  ;;  %v553_v0 = vshrl.u32 %v537_v52, 15  ;;  %v584_v5 = vmul.u32 2221713035, %v1335_v56 }
  0xe6   : > { %v901_v8 = vpop.f32.mrf.mxu0  ;;  %v357_v9 = vpop.f32.mrf.mxu1 }
  0xe7   : > { %974 = vtanh.f32 %v901_v8  ;;  %v600_v23 = vshrl.u32 %v584_v5, 16 }
  0xe8   : > { %v327_v15 = vpop.f32.mrf.mxu0  ;;  %976 = vtanh.f32 %v357_v9  ;;  %v1293_v16 = vpop.f32.mrf.mxu1 }
  0xe9   : > { %978 = vtanh.f32 %v327_v15  ;;  %v616_v55 = vxor.u32 %v600_v23, %v584_v5 }
  0xea   : > { %980 = vtanh.f32 %v907_v48  ;;  %v904_v25 = vpop.f32.mrf.mxu0  ;;  %v367_v28 = vpop.f32.mrf.mxu1 }
  0xeb   : > { %982 = vtanh.f32 %v904_v25  ;;  %v583_v25 = vmul.u32 2221713035, %v1349_v4  ;;  %vm632_vm14 = vcmp.ge.u32.totalorder %v616_v55, 1073741824 }
  0xec   : > { %v965_v34 = vpop.eup %964  ;;  %984 = vtanh.f32 %v367_v28  ;;  %v337_v36 = vpop.f32.mrf.mxu0 }
  0xed   : > { %v916_v38 = vpop.f32.mrf.mxu1  ;;  %v635_v40 = vmul.f32 1.3333334, %v965_v34  ;;  %986 = vtanh.f32 %v337_v36 }
  0xee   : > { %v967_v43 = vpop.eup %966  ;;  %988 = vtanh.f32 %v1280_v1 }
  0xef   : > { %v377_v47 = vpop.f32.mrf.mxu1  ;;  %v634_v48 = vmul.f32 1.3333334, %v967_v43  ;;  %v651_v50 = vsel %vm619_vm1, %v635_v40, 0.0 }
  0xf0   : > { %v969_v53 = vpop.eup %968  ;;  %v674_v54 = vmul.f32 %v1317_v41, %v651_v50  ;;  %990 = vtanh.f32 %v377_v47 }
  0xf1   : > { %v971_v57 = vpop.eup %970  ;;  %v637_v58 = vmul.f32 1.3333334, %v969_v53  ;;  %v650_v59 = vsel %vm618_vm2, %v634_v48, 0.0  ;;  %992 = vtanh.f32 %v1293_v16  ;;  %v569_v16 = vxor.u32 %v553_v0, %v537_v52 }
  0xf2   : > { %v973_v26 = vpop.eup %972  ;;  %v642_v27 = vmul.f32 1.3333334, %v971_v57  ;;  %v692_v60 = vsel %vm192_vm0, %v674_v54, 0.0  ;;  %v673_v61 = vmul.f32 %v1317_v41, %v650_v59  ;;  %994 = vtanh.f32 %v916_v38 }
  0xf3   : > { %v636_v62 = vmul.f32 1.3333334, %v973_v26  ;;  %693 = vadd.xlane.f32.xlu0 %v692_v60  ;;  %v653_v63 = vsel %vm621_vm5, %v637_v58, 0.0  ;;  %v585_v40 = vmul.u32 2221713035, %v569_v16  ;;  %v599_v54 = vshrl.u32 %v583_v25, 16 }
  0xf4   : > { %v975_v1 = vpop.eup %974  ;;  %v658_v2 = vsel %vm626_vm4, %v642_v27, 0.0  ;;  %v689_v12 = vsel %vm192_vm0, %v673_v61, 0.0  ;;  %v676_v21 = vmul.f32 %v1317_v41, %v653_v63 }
  0xf5   : > { %v977_v6 = vpop.eup %976  ;;  %v639_v7 = vmul.f32 1.3333334, %v975_v1  ;;  %v652_v8 = vsel %vm620_vm3, %v636_v62, 0.0  ;;  %v681_v9 = vmul.f32 %v1317_v41, %v658_v2  ;;  %v601_v56 = vshrl.u32 %v585_v40, 16 }
  0xf6   : > { %v979_v10 = vpop.eup %978  ;;  %v644_v11 = vmul.f32 1.3333334, %v977_v6  ;;  %v675_v32 = vmul.f32 %v1317_v41, %v652_v8  ;;  %v698_v36 = vsel %vm192_vm0, %v676_v21, 0.0  ;;  %v615_v60 = vxor.u32 %v599_v54, %v583_v25 }
  0xf7   : > { %v981_v13 = vpop.eup %980  ;;  %v638_v14 = vmul.f32 1.3333334, %v979_v10  ;;  %690 = vadd.xlane.f32.xlu0 %v689_v12  ;;  %v655_v15 = vsel %vm623_vm6, %v639_v7, 0.0  ;;  %v713_v19 = vsel %vm192_vm0, %v681_v9, 0.0  ;;  %v617_v61 = vxor.u32 %v601_v56, %v585_v40 }
  0xf8   : > { %v983_v49 = vpop.eup %982  ;;  %v695_v18 = vsel %vm192_vm0, %v675_v32, 0.0  ;;  %v660_v17 = vsel %vm628_vm8, %v644_v11, 0.0  ;;  %v678_v37 = vmul.f32 %v1317_v41, %v655_v15  ;;  %v643_v47 = vmul.f32 1.3333334, %v981_v13 }
  0xf9   : > { %v985_v28 = vpop.eup %984  ;;  %v641_v29 = vmul.f32 1.3333334, %v983_v49  ;;  %696 = vadd.xlane.f32.xlu1 %v695_v18  ;;  %v654_v31 = vsel %vm622_vm7, %v638_v14, 0.0  ;;  %v683_v43 = vmul.f32 %v1317_v41, %v660_v17  ;;  %vm631_vm15 = vcmp.ge.u32.totalorder %v615_v60, 1073741824 }
  0xfa   : > { %v987_v33 = vpop.eup %986  ;;  %v646_v34 = vmul.f32 1.3333334, %v985_v28  ;;  %v677_v38 = vmul.f32 %v1317_v41, %v654_v31  ;;  %v704_v52 = vsel %vm192_vm0, %v678_v37, 0.0  ;;  %v659_v44 = vsel %vm627_vm11, %v643_v47, 0.0 }
  0xfb   : > { %714 = vadd.xlane.f32.xlu0 %v713_v19  ;;  %v657_v39 = vsel %vm625_vm9, %v641_v29, 0.0  ;;  %v989_v46 = vpop.eup %988  ;;  %v640_v48 = vmul.f32 1.3333334, %v987_v33  ;;  %v719_v30 = vsel %vm192_vm0, %v683_v43, 0.0  ;;  %v682_v35 = vmul.f32 %v1317_v41, %v659_v44 }
  0xfc   : > { %v701_v20 = vsel %vm192_vm0, %v677_v38, 0.0  ;;  %v662_v50 = vsel %vm630_vm10, %v646_v34, 0.0  ;;  %v680_v53 = vmul.f32 %v1317_v41, %v657_v39  ;;  %v645_v57 = vmul.f32 1.3333334, %v989_v46 }
  0xfd   : > { %699 = vadd.xlane.f32.xlu1 %v698_v36  ;;  %v991_v42 = vpop.eup %990  ;;  %v685_v45 = vmul.f32 %v1317_v41, %v662_v50  ;;  %v656_v58 = vsel %vm624_vm12, %v640_v48, 0.0  ;;  %vm633_vm1 = vcmp.ge.u32.totalorder %v617_v61, 1073741824  ;;  %v716_v4 = vsel %vm192_vm0, %v682_v35, 0.0 }
  0xfe   : > { %v648_v59 = vmul.f32 1.3333334, %v991_v42  ;;  %v993_v26 = vpop.eup %992  ;;  %v710_v27 = vsel %vm192_vm0, %v680_v53, 0.0  ;;  %v679_v0 = vmul.f32 %v1317_v41, %v656_v58  ;;  %v661_v51 = vsel %vm629_vm13, %v645_v57, 0.0 }
  0xff   : > { %702 = vadd.xlane.f32.xlu0 %v701_v20  ;;  %v995_v62 = vpop.eup %994  ;;  %v725_v63 = vsel %vm192_vm0, %v685_v45, 0.0  ;;  %v647_v1 = vmul.f32 1.3333334, %v993_v26  ;;  %v684_v5 = vmul.f32 %v1317_v41, %v661_v51 }
 0x100   : > { %v664_v2 = vsel %vm632_vm14, %v648_v59, 0.0  ;;  %v649_v3 = vmul.f32 1.3333334, %v995_v62  ;;  %v707_v6 = vsel %vm192_vm0, %v679_v0, 0.0 }
 0x101   : > { %705 = vadd.xlane.f32.xlu1 %v704_v52  ;;  %v687_v7 = vmul.f32 %v1317_v41, %v664_v2  ;;  %v663_v8 = vsel %vm631_vm15, %v647_v1, 0.0  ;;  %v722_v10 = vsel %vm192_vm0, %v684_v5, 0.0 }
 0x102   : > { %v665_v9 = vsel %vm633_vm1, %v649_v3, 0.0  ;;  %v686_v11 = vmul.f32 %v1317_v41, %v663_v8 }
 0x103   : > { %720 = vadd.xlane.f32.xlu0 %v719_v30  ;;  %v731_v12 = vsel %vm192_vm0, %v687_v7, 0.0  ;;  %v688_v32 = vmul.f32 %v1317_v41, %v665_v9 }
 0x104   : > { %v728_v21 = vsel %vm192_vm0, %v686_v11, 0.0 }
 0x105   : > { %711 = vadd.xlane.f32.xlu1 %v710_v27  ;;  %v734_v13 = vsel %vm192_vm0, %v688_v32, 0.0 }
 0x107   : > { %726 = vadd.xlane.f32.xlu0 %v725_v63 }
 0x109   : > { %717 = vadd.xlane.f32.xlu1 %v716_v4 }
 0x10b   : > { %708 = vadd.xlane.f32.xlu0 %v707_v6 }
 0x10d   : > { %723 = vadd.xlane.f32.xlu1 %v722_v10 }
 0x10f   : > { %732 = vadd.xlane.f32.xlu0 %v731_v12 }
 0x111   : > { %729 = vadd.xlane.f32.xlu1 %v728_v21 }
 0x115   : > { %735 = vadd.xlane.f32.xlu1 %v734_v13 }
 0x17c   : > { %v694_v14 = vpop.xlane.xlu0 %693 }
 0x180   : > { %v691_v15 = vpop.xlane.xlu0 %690 }
 0x181   : > { %737 = vxpose.xlu0.b32.start [1/16] (narrow) %v691_v15, 8 }
 0x182   : > { %v697_v49 = vpop.xlane.xlu1 %696 }
 0x184   : > { %v715_v16 = vpop.xlane.xlu0 %714 }
 0x185   : > { %738 = vxpose.xlu0.b32.cont [2/16] (narrow) %v694_v14, 8 }
 0x186   : > { %v700_v19 = vpop.xlane.xlu1 %699 }
 0x188   : > { %v703_v18 = vpop.xlane.xlu0 %702 }
 0x189   : > { %739 = vxpose.xlu0.b32.cont [3/16] (narrow) %v697_v49, 8 }
 0x18a   : > { %v706_v25 = vpop.xlane.xlu1 %705 }
 0x18c   : > { %v721_v24 = vpop.xlane.xlu0 %720 }
 0x18d   : > { %740 = vxpose.xlu0.b32.cont [4/16] (narrow) %v700_v19, 8 }
 0x18e   : > { %v712_v29 = vpop.xlane.xlu1 %711 }
 0x190   : > { %v727_v41 = vpop.xlane.xlu0 %726 }
 0x191   : > { %741 = vxpose.xlu0.b32.cont [5/16] (narrow) %v703_v18, 8 }
 0x192   : > { %v718_v31 = vpop.xlane.xlu1 %717 }
 0x194   : > { %v709_v28 = vpop.xlane.xlu0 %708 }
 0x195   : > { %742 = vxpose.xlu0.b32.cont [6/16] (narrow) %v706_v25, 8 }
 0x196   : > { %v724_v17 = vpop.xlane.xlu1 %723 }
 0x198   : > { %v733_v33 = vpop.xlane.xlu0 %732 }
 0x199   : > { %743 = vxpose.xlu0.b32.cont [7/16] (narrow) %v709_v28, 8 }
 0x19a   : > { %v730_v23 = vpop.xlane.xlu1 %729 }
 0x19d   : > { %744 = vxpose.xlu0.b32.cont [8/16] (narrow) %v712_v29, 8 }
 0x19e   : > { %v736_v34 = vpop.xlane.xlu1 %735 }
 0x1a1   : > { %745 = vxpose.xlu0.b32.cont [9/16] (narrow) %v715_v16, 8 }
 0x1a5   : > { %746 = vxpose.xlu0.b32.cont [10/16] (narrow) %v718_v31, 8 }
 0x1a9   : > { %747 = vxpose.xlu0.b32.cont [11/16] (narrow) %v721_v24, 8 }
 0x1ad   : > { %748 = vxpose.xlu0.b32.cont [12/16] (narrow) %v724_v17, 8 }
 0x1b1   : > { %749 = vxpose.xlu0.b32.cont [13/16] (narrow) %v727_v41, 8 }
 0x1b5   : > { %750 = vxpose.xlu0.b32.cont [14/16] (narrow) %v730_v23, 8 }
 0x1b9   : > { %751 = vxpose.xlu0.b32.cont [15/16] (narrow) %v733_v33, 8 }
 0x1bd   : > { %752 = vxpose.xlu0.b32.end [16/16] (narrow) %v736_v34, 8 }
 0x1fd   : > { %v753_v36 = vpop.trf.xlu0 }
 0x1fe   : > { %769 = vst [vmem:[%s165_s29] sm:$0x1] %v753_v36 }
 0x1ff   : > { %1009 = shalt.err (!%p1006_p3)
}
 0x200   : > { %s1010_s14 = scalar_lea.hbm %s781_s8, 16  ;;  %s1014_s16 = scalar_lea.hbm %s1444_s4, 64 }
 0x201   : > { %p1011_p4 = scmp.ne.s32.totalorder %s781_s8, %s1010_s14  ;;  %p1015_p9 = scmp.lt.s32.totalorder %s781_s8, %s1444_s4 }
 0x202   : > { %p1016_p10 = scmp.lt.s32.totalorder %s1014_s16, %s1010_s14 }
 0x203   : > { %p1012_p7 = pnand %p1011_p4, %p1125_p5 }
 0x204   : > { %p1017_p11 = por %p1016_p10, %p1015_p9 }
 0x205   : > { %p1013_p8 = pneg %p1012_p7 }
 0x207   : > { %p1018_p12 = pnand %p1017_p11, %p1013_p8 }
 0x209   : > { %1021 = shalt.err (!%p1018_p12)
}
 0x20a   : > { %925 = dma.vmem_to_hbm [thread:$0]  (%p1125_p5), %s1401_s30, 16, %s781_s8, %s771_s9  }
 0x20b PF: > { %p931_p13 = scmp.ge.s32.totalorder %s1056_s20, 2  ;;  %s795_s0 = sand.u32 1, %s1044_s17  }
 0x20c   : > { %s796_s24 = scalar_lea.sflag [#allocation5], %s795_s0 }
 0x20d   : > { %p928_p0 = pnand %p931_p13, %p1129_p6 }
 0x20f   : > { %p929_p1 = pneg %p928_p0 }
 0x211   : > { %1039 = dma.done.wait (%p929_p1), %s796_s24, 16  }
 0x212   : > { %1041 = vsyncadd (%p929_p1), %s796_s24, 4294967280  ;;  %p15_p2 = scmp.ge.s32.totalorder %s1112_s22, 6   ;;  %s1447_s17 = smov %s1048_s18 }
 0x213   : > { %s1448_s18 = smov %s1052_s19  ;;  %s1449_s19 = smov %s1123_s25 }
 0x214   : > { %s1450_s20 = smov %s1112_s22  ;;  %17 = sbr.rel (!%p15_p2) target bundleno = 5 (0x5), region = 67 }
 0x219   :  { %800 = vsyncpa [#allocation5], 1 }
 0x21a   :  { %802 = vsyncpa [#allocation5 + $0x1], 1 }

</bundles_post_ra>
